<compile_context>
chip_gen: v5e
topology: v5e:2x2
jax: 0.10.0
libtpu: 0.0.40
codegen_flags: <defaults>
</compile_context>

<pallas_src>
import jax
import jax.numpy as jnp
from jax.experimental import pallas as pl
from jax.experimental.pallas import tpu as pltpu

IN_FEATURES = 128
OUT_FEATURES = 256
OUT_KEEP = 128            # v1[:, :128]
MAX_BATCH_TILE = 4096     # double-buffered x+out tiles ~8 MiB -> fits v5e's 16 MiB scoped VMEM
SMALL_BATCH_CUTOFF = 128  # below this, XLA's fused dot beats kernel launch + DMA setup


def _round_up(x, m):
    return ((x + m - 1) // m) * m


def linear_slice_kernel(x_ref, w_ref, b_ref, o_ref):
    # (tm,128) @ (128,128) on the MXU, f32 accumulate, bias add on the VPU.
    acc = jnp.dot(x_ref[...], w_ref[...], preferred_element_type=jnp.float32)
    o_ref[...] = (acc + b_ref[...]).astype(o_ref.dtype)


def model_forward(x, w, b):
    """x: (B, 128) f32, w: (128, 256) f32, b: (1, 256) f32 -> (B, 128) f32.

    Implements (x @ w + b)[:, :128]. Large batches go through the Pallas
    kernel with the column slice fused into the W/b BlockSpecs; tiny batches
    use a plain XLA dot (kernel overhead would dominate).
    """
    B = x.shape[0]

    # Tiny-batch fast path: one small MXU op, no pallas_call overhead.
    if B <= SMALL_BATCH_CUTOFF:
        return (jnp.dot(x, w[:, :OUT_KEEP], preferred_element_type=jnp.float32)
                + b[:, :OUT_KEEP]).astype(x.dtype)

    # Pallas path: even number of batch tiles (>=2) so v7x's two TensorCores
    # split the grid evenly; tile rows are a multiple of 8 and capped at
    # MAX_BATCH_TILE to stay inside v5e's default scoped VMEM.
    n_steps = max(2, pl.cdiv(B, MAX_BATCH_TILE))
    if n_steps % 2:
        n_steps += 1
    tm = min(_round_up(pl.cdiv(B, n_steps), 8), MAX_BATCH_TILE)
    grid = (pl.cdiv(B, tm),)

    return pl.pallas_call(
        linear_slice_kernel,
        out_shape=jax.ShapeDtypeStruct((B, OUT_KEEP), x.dtype),
        grid=grid,
        in_specs=[
            # x: one batch tile per grid step (double-buffered by default).
            pl.BlockSpec((tm, IN_FEATURES), lambda i: (i, 0)),
            # w: only the first 128-column block is mapped -> fuses the
            # [:, :128] slice, halving W DMA traffic. Constant index map, so
            # single-buffer it: no dead second VMEM buffer.
            pl.BlockSpec((IN_FEATURES, OUT_KEEP), lambda i: (0, 0),
                         pipeline_mode=pl.Buffered(1)),
            # b: likewise first 128 columns, single-buffered.
            pl.BlockSpec((1, OUT_KEEP), lambda i: (0, 0),
                         pipeline_mode=pl.Buffered(1)),
        ],
        out_specs=pl.BlockSpec((tm, OUT_KEEP), lambda i: (i, 0)),
        compiler_params=pltpu.CompilerParams(
            # Batch tiles are independent -> "parallel" lets v7x shard the
            # (even-length) grid across both TensorCores; harmless on v5e/v6e.
            dimension_semantics=("parallel",)
        ),
    )(x, w, b)


if __name__ == "__main__":
    key = jax.random.PRNGKey(0)
    kx, kw, kb, kx2 = jax.random.split(key, 4)

    # Deterministic parameter init mimicking torch.nn.Linear default
    # (uniform(-1/sqrt(fan_in), 1/sqrt(fan_in))).
    bound = 1.0 / (IN_FEATURES ** 0.5)
    # torch stores weight as (out, in); we keep the transposed (in, out) layout.
    w = jax.random.uniform(kw, (IN_FEATURES, OUT_FEATURES), dtype=jnp.float32,
                           minval=-bound, maxval=bound)
    b = jax.random.uniform(kb, (1, OUT_FEATURES), dtype=jnp.float32,
                           minval=-bound, maxval=bound)

    # 1) Tiny batch: exercises the jnp fast path.
    B_small = 8
    x_small = jax.random.normal(kx, (B_small, IN_FEATURES), dtype=jnp.float32)
    out_small = model_forward(x_small, w, b)
    jax.block_until_ready(out_small)
    ref_small = (x_small @ w + b)[:, :OUT_KEEP]
    assert out_small.shape == (B_small, OUT_KEEP)
    assert jnp.allclose(out_small, ref_small, atol=1e-5, rtol=1e-5)

    # 2) Larger batch: exercises the Pallas kernel (grid of 2 even 128-row tiles).
    B_large = 256
    x_large = jax.random.normal(kx2, (B_large, IN_FEATURES), dtype=jnp.float32)
    out_large = model_forward(x_large, w, b)
    jax.block_until_ready(out_large)
    ref_large = (x_large @ w + b)[:, :OUT_KEEP]
    assert out_large.shape == (B_large, OUT_KEEP)
    assert jnp.allclose(out_large, ref_large, atol=1e-5, rtol=1e-5)

    print("KERNEL_OK")
</pallas_src>

<mosaic_0001>
module attributes {stable_mosaic.version = 11 : i64} {
  func.func @linear_slice_kernel(%arg0: i32, %arg1: memref<128x128xf32, #tpu.memory_space<vmem>>, %arg2: memref<128x128xf32, #tpu.memory_space<vmem>>, %arg3: memref<1x128xf32, #tpu.memory_space<vmem>>, %arg4: memref<128x128xf32, #tpu.memory_space<vmem>>) attributes {dimension_semantics = [#tpu.dimension_semantics<parallel>], iteration_bounds = array<i64: 2>, scalar_prefetch = 0 : i64, scratch_operands = 0 : i64, tpu.core_type = #tpu.core_type<tc>, window_params = [{transform_indices = @transform_0, window_bounds = array<i64: 128, 128>}, {pipeline_mode = #tpu.pipeline_mode<synchronous>, transform_indices = @transform_1, window_bounds = array<i64: 128, 128>}, {pipeline_mode = #tpu.pipeline_mode<synchronous>, transform_indices = @transform_2, window_bounds = array<i64: 1, 128>}, {transform_indices = @transform_3, window_bounds = array<i64: 128, 128>}]} {
    %c0 = arith.constant 0 : index
    %c0_0 = arith.constant 0 : index
    %0 = vector.load %arg1[%c0, %c0_0] : memref<128x128xf32, #tpu.memory_space<vmem>>, vector<128x128xf32>
    %c0_1 = arith.constant 0 : index
    %c0_2 = arith.constant 0 : index
    %1 = vector.load %arg2[%c0_1, %c0_2] : memref<128x128xf32, #tpu.memory_space<vmem>>, vector<128x128xf32>
    %cst = arith.constant dense<0.000000e+00> : vector<128x128xf32>
    %2 = tpu.matmul %0, %1, %cst {dimension_numbers = #tpu.dot_dimension_numbers<[1], [0], [0], [1], [0, 0, 1, 1], [], []>} : vector<128x128xf32>, vector<128x128xf32>, vector<128x128xf32> -> vector<128x128xf32>
    %c0_3 = arith.constant 0 : index
    %c0_4 = arith.constant 0 : index
    %3 = vector.load %arg3[%c0_3, %c0_4] : memref<1x128xf32, #tpu.memory_space<vmem>>, vector<1x128xf32>
    %4 = vector.broadcast %3 : vector<1x128xf32> to vector<128x128xf32>
    %5 = arith.addf %2, %4 : vector<128x128xf32>
    %c0_5 = arith.constant 0 : index
    %c0_6 = arith.constant 0 : index
    %6 = vector.load %arg4[%c0_5, %c0_6] : memref<128x128xf32, #tpu.memory_space<vmem>>, vector<128x128xf32>
    tpu.vector_store %arg4[%c0_5, %c0_6], %5 {strides = array<i32>} : memref<128x128xf32, #tpu.memory_space<vmem>>, vector<128x128xf32>,
    return
  }
  func.func @transform_0(%arg0: i32) -> (i32, i32) {
    %c0_i32 = arith.constant 0 : i32
    %c0_i32_0 = arith.constant 0 : i32
    return %arg0, %c0_i32 : i32, i32
  }
  func.func @transform_1(%arg0: i32) -> (i32, i32) {
    %c0_i32 = arith.constant 0 : i32
    %c0_i32_0 = arith.constant 0 : i32
    %c0_i32_1 = arith.constant 0 : i32
    return %c0_i32, %c0_i32_0 : i32, i32
  }
  func.func @transform_2(%arg0: i32) -> (i32, i32) {
    %c0_i32 = arith.constant 0 : i32
    %c0_i32_0 = arith.constant 0 : i32
    %c0_i32_1 = arith.constant 0 : i32
    return %c0_i32, %c0_i32_0 : i32, i32
  }
  func.func @transform_3(%arg0: i32) -> (i32, i32) {
    %c0_i32 = arith.constant 0 : i32
    %c0_i32_0 = arith.constant 0 : i32
    return %arg0, %c0_i32 : i32, i32
  }
}

</mosaic_0001>

<bundles_post_ra>
// kernel: tpu_custom_call.1
= control target key start
LH: loop header
LB: loop body
LE: loop exit
PB: predicated region body
PF: predicated region fallthrough
CT: control target
= control target key end

     0   :  { %8 = vsyncpa [#allocation3], 0  ;;  %s964_s0 = inlined_call_operand.hbm [shape: f32[256,128], index: 0, kind: input, shape index: {}]   ;;  %s965_s1 = inlined_call_operand.hbm [shape: f32[128,256], index: 1, kind: input, shape index: {}]   ;;  %s966_s2 = inlined_call_operand.hbm [shape: f32[1,256], index: 2, kind: input, shape index: {}]   ;;  %s967_s3 = inlined_call_operand.hbm [shape: f32[256,128], index: 3, kind: output, shape index: {}]  }
   0x1   :  { %10 = vsyncpa [#allocation3 + $0x1], 0 }
   0x2   :  { %11 = vsyncpa [#allocation6], 0 }
   0x3   :  { %12 = vsyncpa [#allocation4], 0 }
   0x4   :  { %14 = vsyncpa [#allocation4 + $0x1], 0  ;;  %s779_s12 = smov 0   ;;  %s781_s13 = smov 0  }
   0x5   :  { %s783_s14 = smov 0   ;;  %s785_s15 = smov 0  }
   0x6 LB: > { %s130_s18 = sshll.u32 %s965_s1, 4  ;;  %s803_s19 = sadd.s32 4294967295, %s750_s15   ;;  %s750_s15 = sphi %s785_s15, %s977_s15   ;;  %s746_s14 = sphi %s783_s14, %s976_s14   ;;  %s742_s13 = sphi %s781_s13, %s975_s13   ;;  %s738_s12 = sphi %s779_s12, %s974_s12   ;;  %s131_s18 = int_to_ptr.hbm [resolvable:$true] %s130_s18 }
   0x7   : > { %p450_p0 = scmp.ge.s32.totalorder %s750_s15, 1  ;;  %p41_p1 = scmp.eq.s32.totalorder %s803_s19, 0 }
   0x8   : > { %p119_p2 = scmp.lt.s32.totalorder %s750_s15, 3  ;;  %s752_s21 = smov [#allocation5]  }
   0x9   : > { %s132_s22 = sshll.u32 %s752_s21, 4  ;;  %s145_s25 = sshll.u32 %s966_s2, 4  ;;  %s133_s22 = int_to_ptr.vmem [resolvable:$true] %s132_s22  ;;  %s146_s25 = int_to_ptr.hbm [resolvable:$true] %s145_s25 }
   0xa   : > { %p808_p3 = pnand %p450_p0, %p119_p2  ;;  %s753_s26 = smov [#allocation7]  }
   0xb   : > { %s147_s27 = sshll.u32 %s753_s26, 4  ;;  %s754_s28 = smov 256   ;;  %s148_s27 = int_to_ptr.vmem [resolvable:$true] %s147_s27 }
   0xc   : > { %p529_p4 = pneg %p808_p3  ;;  %s755_s29 = smov 128  }
   0xd   : > { %s756_s30 = smov 8   ;;  %s449_s4 = sadd.s32 4294967294, %s750_s15  }
   0xe   : > { %p530_p6 = pnand %p529_p4, %p41_p1  ;;  %s824_s5 = sadd.s32 1, %s750_s15  }
   0xf   : > { %s27_s6 = sadd.s32 1, %s746_s14  ;;  %s24_s7 = ssub.s32 %s750_s15, %s824_s5 }
  0x10   : > { %532 = dma.hbm_to_vmem [thread:$0]  (!%p530_p6), %s131_s18, 2048, %s133_s22, [#allocation6], %s754_s28, %s755_s29, %s756_s30  }
  0x11   : > { %535 = dma.hbm_to_vmem [thread:$0]  (!%p530_p6), %s146_s25, 16, %s148_s27, [#allocation6]  }
  0x12   : > { %p34_p7 = scmp.ne.s32.totalorder %s746_s14, %s742_s13  ;;  %p25_p8 = scmp.eq.s32.totalorder %s24_s7, 0 }
  0x13   : > { %p35_p9 = scmp.eq.s32.totalorder %s750_s15, 0  ;;  %p40_p10 = scmp.ne.s32.totalorder %s742_s13, %s738_s12 }
  0x14   : > { %p106_p11 = scmp.eq.s32.totalorder %s803_s19, 1  ;;  %p112_p0 = scmp.eq.s32.totalorder %s449_s4, 1 }
  0x15   : > { %s836_s8 = scalar_select %p25_p8, %s746_s14, %s27_s6  }
  0x16   : > { %p840_p12 = por %p41_p1, %p40_p10  ;;  %p844_p13 = por %p106_p11, %p34_p7 }
  0x17   : > { %p36_p2 = por %p35_p9, %p34_p7  ;;  %s158_s11 = sand.u32 1, %s746_s14  }
  0x18   : > { %p849_p4 = por %p112_p0, %p40_p10  ;;  %p546_p6 = scmp.lt.s32.totalorder %s750_s15, 2 }
  0x19   : > { %s454_s17 = sshll.u32 %s158_s11, 7  ;;  %s467_s18 = sshll.u32 %s750_s15, 7 }
  0x1a   : > { %s167_s23 = scalar_lea.hbm %s964_s0, %s467_s18  ;;  %s162_s25 = scalar_lea.vmem [#allocation2], %s454_s17 }
  0x1b   : > { %s168_s24 = sshll.u32 %s167_s23, 4  ;;  %s170_s26 = sshll.u32 %s162_s25, 4  ;;  %s169_s24 = int_to_ptr.hbm [resolvable:$true] %s168_s24  ;;  %s171_s26 = int_to_ptr.vmem [resolvable:$true] %s170_s26 }
  0x1c   : > { %p858_p8 = pnand %p546_p6, %p36_p2  ;;  %s159_s28 = scalar_lea.sflag [#allocation3], %s158_s11 }
  0x1d   : > { %s650_s4 = sshra.s32 %s169_s24, 4  ;;  %s657_s17 = scalar_lea.hbm %s964_s0, 256  ;;  %s651_s4 = int_to_ptr.hbm [resolvable:$true] %s650_s4 }
  0x1e   : > { %s652_s6 = scalar_lea.hbm %s651_s4, 128  ;;  %p654_p9 = pneg %p858_p8 }
  0x1f   : > { %p653_p7 = scmp.ne.s32.totalorder %s651_s4, %s652_s6  ;;  %p658_p0 = scmp.lt.s32.totalorder %s651_s4, %s964_s0 }
  0x20   : > { %p659_p2 = scmp.lt.s32.totalorder %s657_s17, %s652_s6 }
  0x21   : > { %p655_p10 = pnand %p654_p9, %p653_p7 }
  0x22   : > { %p660_p6 = por %p659_p2, %p658_p0 }
  0x23   : > { %p656_p11 = pneg %p655_p10 }
  0x25   : > { %p661_p5 = pnand %p660_p6, %p656_p11 }
  0x27   : > { %664 = shalt.err (!%p661_p5)
}
  0x28   : > { %539 = dma.hbm_to_vmem [thread:$0]  (!%p858_p8), %s169_s24, 2048, %s171_s26, %s159_s28, %s755_s29, %s755_s29, %s756_s30  }
  0x29   : > { %182 = sbr.rel (%p808_p3) target bundleno = 244 (0xf4), region = 32  ;;  %s878_s11 = sand.u32 (!%p808_p3), 1, %s742_s13  }
  0x2a   : > { %s458_s23 = sshll.u32 (!%p808_p3), %s878_s11, 7  ;;  %s185_s25 = scalar_lea.sflag (!%p808_p3), [#allocation3], %s878_s11 }
  0x2b   : > { %s884_s4 = scalar_lea.vmem (!%p808_p3), [#allocation2], %s458_s23 }
  0x2e   : > { %725 = dma.done.wait (%p840_p12), %s185_s25, 2048  }
  0x2f   : > { %727 = vsyncadd (%p840_p12), %s185_s25, 4294965248 }
  0x30   : > { %729 = dma.done.wait (%p41_p1), [#allocation6], 2064  }
  0x31   : > { %731 = vsyncadd (%p41_p1), [#allocation6], 4294965232  ;;  %v255_v0 = vld [vmem:[#allocation5 + $0x78] sm:$0xff]  ;;  %v254_v1 = vld [vmem:[#allocation5 + $0x70] sm:$0xff]  ;;  %s912_s20 = scalar_lea.vmem [#allocation8], %s458_s23  ;;  %s468_s29 = sshll.u32 %s803_s19, 7 }
  0x32   : > { %470 = vmatpush.msra.mxu2 %v255_v0  ;;  %471 = vmatpush.msra.mxu3 %v255_v0  ;;  %v253_v2 = vld [vmem:[#allocation5 + $0x68] sm:$0xff]  ;;  %v252_v3 = vld [vmem:[#allocation5 + $0x60] sm:$0xff]  ;;  %v251_v4 = vld [vmem:[#allocation5 + $0x58] sm:$0xff]  ;;  %s353_s24 = scalar_lea.hbm %s967_s3, %s468_s29  ;;  %s354_s26 = sshll.u32 %s912_s20, 4  ;;  %s355_s26 = int_to_ptr.vmem [resolvable:$true] %s354_s26 }
  0x33   : > { %260 = vmatpush.msra.mxu0 %v255_v0  ;;  %469 = vmatpush.msra.mxu1 %v255_v0  ;;  %v250_v5 = vld [vmem:[#allocation5 + $0x50] sm:$0xff]  ;;  %v249_v6 = vld [vmem:[#allocation5 + $0x48] sm:$0xff]  ;;  %v248_v7 = vld [vmem:[#allocation5 + $0x40] sm:$0xff]  ;;  %s356_s27 = sshll.u32 %s353_s24, 4  ;;  %s342_s19 = scalar_lea.sflag [#allocation4], %s878_s11  ;;  %s357_s27 = int_to_ptr.hbm [resolvable:$true] %s356_s27 }
  0x34   : > { %473 = vmatpush.msra.mxu2 %v254_v1  ;;  %474 = vmatpush.msra.mxu3 %v254_v1  ;;  %v247_v8 = vld [vmem:[#allocation5 + $0x38] sm:$0xff]  ;;  %v246_v9 = vld [vmem:[#allocation5 + $0x30] sm:$0xff]  ;;  %v245_v10 = vld [vmem:[#allocation5 + $0x28] sm:$0xff]  ;;  %s694_s28 = sshra.s32 %s357_s27, 4  ;;  %s700_s17 = scalar_lea.hbm %s967_s3, 256  ;;  %s695_s28 = int_to_ptr.hbm [resolvable:$true] %s694_s28 }
  0x35   : > { %261 = vmatpush.msra.mxu0 %v254_v1  ;;  %472 = vmatpush.msra.mxu1 %v254_v1  ;;  %v244_v11 = vld [vmem:[#allocation5 + $0x20] sm:$0xff]  ;;  %v243_v12 = vld [vmem:[#allocation5 + $0x18] sm:$0xff]  ;;  %v242_v13 = vld [vmem:[#allocation5 + $0x10] sm:$0xff]  ;;  %s696_s6 = scalar_lea.hbm %s695_s28, 128  ;;  %p701_p12 = scmp.lt.s32.totalorder %s695_s28, %s967_s3 }
  0x36   : > { %476 = vmatpush.msra.mxu2 %v253_v2  ;;  %477 = vmatpush.msra.mxu3 %v253_v2  ;;  %v241_v14 = vld [vmem:[#allocation5 + $0x8] sm:$0xff]  ;;  %v240_v15 = vld [vmem:[#allocation5] sm:$0xff]  ;;  %v234_v24 = vld [vmem:[%s884_s4 + $0x50] sm:$0xff]  ;;  %p697_p1 = scmp.ne.s32.totalorder %s695_s28, %s696_s6  ;;  %p702_p8 = scmp.lt.s32.totalorder %s700_s17, %s696_s6 }
  0x37   : > { %262 = vmatpush.msra.mxu0 %v253_v2  ;;  %475 = vmatpush.msra.mxu1 %v253_v2  ;;  %v232_v16 = vld [vmem:[%s884_s4 + $0x40] sm:$0xff]  ;;  %v233_v20 = vld [vmem:[%s884_s4 + $0x48] sm:$0xff]  ;;  %v238_v25 = vld [vmem:[%s884_s4 + $0x70] sm:$0xff] }
  0x38   : > { %479 = vmatpush.msra.mxu2 %v252_v3  ;;  %480 = vmatpush.msra.mxu3 %v252_v3  ;;  %v236_v17 = vld [vmem:[%s884_s4 + $0x60] sm:$0xff]  ;;  %v237_v21 = vld [vmem:[%s884_s4 + $0x68] sm:$0xff]  ;;  %v226_v26 = vld [vmem:[%s884_s4 + $0x10] sm:$0xff]  ;;  %p698_p3 = pnand %p697_p1, %p844_p13  ;;  %p703_p7 = por %p702_p8, %p701_p12 }
  0x39   : > { %263 = vmatpush.msra.mxu0 %v252_v3  ;;  %478 = vmatpush.msra.mxu1 %v252_v3  ;;  %v224_v18 = vld [vmem:[%s884_s4] sm:$0xff]  ;;  %v225_v22 = vld [vmem:[%s884_s4 + $0x8] sm:$0xff]  ;;  %v230_v27 = vld [vmem:[%s884_s4 + $0x30] sm:$0xff] }
  0x3a   : > { %482 = vmatpush.msra.mxu2 %v251_v4  ;;  %483 = vmatpush.msra.mxu3 %v251_v4  ;;  %v228_v19 = vld [vmem:[%s884_s4 + $0x20] sm:$0xff]  ;;  %v229_v23 = vld [vmem:[%s884_s4 + $0x28] sm:$0xff]  ;;  %v235_v28 = vld [vmem:[%s884_s4 + $0x58] sm:$0xff]  ;;  %p699_p5 = pneg %p698_p3 }
  0x3b   : > { %264 = vmatpush.msra.mxu0 %v251_v4  ;;  %481 = vmatpush.msra.mxu1 %v251_v4  ;;  %v239_v29 = vld [vmem:[%s884_s4 + $0x78] sm:$0xff]  ;;  %v589_v32 = vld [vmem:[#allocation7] ss:$0 sm:$0xff] }
  0x3c   : > { %485 = vmatpush.msra.mxu2 %v250_v5  ;;  %486 = vmatpush.msra.mxu3 %v250_v5  ;;  %v227_v30 = vld [vmem:[%s884_s4 + $0x18] sm:$0xff]  ;;  %p704_p9 = pnand %p703_p7, %p699_p5 }
  0x3d   : > { %265 = vmatpush.msra.mxu0 %v250_v5  ;;  %484 = vmatpush.msra.mxu1 %v250_v5  ;;  %v231_v31 = vld [vmem:[%s884_s4 + $0x38] sm:$0xff] }
  0x3e   : > { %488 = vmatpush.msra.mxu2 %v249_v6  ;;  %489 = vmatpush.msra.mxu3 %v249_v6 }
  0x3f   : > { %266 = vmatpush.msra.mxu0 %v249_v6  ;;  %487 = vmatpush.msra.mxu1 %v249_v6 }
  0x40   : > { %491 = vmatpush.msra.mxu2 %v248_v7  ;;  %492 = vmatpush.msra.mxu3 %v248_v7 }
  0x41   : > { %267 = vmatpush.msra.mxu0 %v248_v7  ;;  %490 = vmatpush.msra.mxu1 %v248_v7 }
  0x42   : > { %494 = vmatpush.msra.mxu2 %v247_v8  ;;  %495 = vmatpush.msra.mxu3 %v247_v8 }
  0x43   : > { %268 = vmatpush.msra.mxu0 %v247_v8  ;;  %493 = vmatpush.msra.mxu1 %v247_v8 }
  0x44   : > { %497 = vmatpush.msra.mxu2 %v246_v9  ;;  %498 = vmatpush.msra.mxu3 %v246_v9 }
  0x45   : > { %269 = vmatpush.msra.mxu0 %v246_v9  ;;  %496 = vmatpush.msra.mxu1 %v246_v9 }
  0x46   : > { %500 = vmatpush.msra.mxu2 %v245_v10  ;;  %501 = vmatpush.msra.mxu3 %v245_v10 }
  0x47   : > { %270 = vmatpush.msra.mxu0 %v245_v10  ;;  %499 = vmatpush.msra.mxu1 %v245_v10 }
  0x48   : > { %503 = vmatpush.msra.mxu2 %v244_v11  ;;  %504 = vmatpush.msra.mxu3 %v244_v11 }
  0x49   : > { %271 = vmatpush.msra.mxu0 %v244_v11  ;;  %502 = vmatpush.msra.mxu1 %v244_v11 }
  0x4a   : > { %506 = vmatpush.msra.mxu2 %v243_v12  ;;  %507 = vmatpush.msra.mxu3 %v243_v12 }
  0x4b   : > { %272 = vmatpush.msra.mxu0 %v243_v12  ;;  %505 = vmatpush.msra.mxu1 %v243_v12 }
  0x4c   : > { %509 = vmatpush.msra.mxu2 %v242_v13  ;;  %510 = vmatpush.msra.mxu3 %v242_v13 }
  0x4d   : > { %273 = vmatpush.msra.mxu0 %v242_v13  ;;  %508 = vmatpush.msra.mxu1 %v242_v13 }
  0x4e   : > { %512 = vmatpush.msra.mxu2 %v241_v14  ;;  %513 = vmatpush.msra.mxu3 %v241_v14 }
  0x4f   : > { %274 = vmatpush.msra.mxu0 %v241_v14  ;;  %511 = vmatpush.msra.mxu1 %v241_v14 }
  0x50   : > { %515 = vmatpush.msra.mxu2 %v240_v15  ;;  %516 = vmatpush.msra.mxu3 %v240_v15 }
  0x51   : > { %300 = vmatmul.f32.vlgmr.msra.gmra.mxu2 %v232_v16  ;;  %312 = vmatmul.f32.vlgmr.msra.gmra.mxu3 %v236_v17 }
  0x52   : > { %275 = vmatpush.msra.mxu0 %v240_v15  ;;  %514 = vmatpush.msra.mxu1 %v240_v15 }
  0x53   : > { %276 = vmatmul.f32.vlgmr.msra.gmra.mxu0 %v224_v18  ;;  %288 = vmatmul.f32.vlgmr.msra.gmra.mxu1 %v228_v19 }
  0x59   : > { %303 = vmatmul.f32.gmra.mxu2 %v233_v20  ;;  %315 = vmatmul.f32.gmra.mxu3 %v237_v21 }
  0x5b   : > { %279 = vmatmul.f32.gmra.mxu0 %v225_v22  ;;  %291 = vmatmul.f32.gmra.mxu1 %v229_v23 }
  0x61   : > { %306 = vmatmul.f32.gmra.mxu2 %v234_v24  ;;  %318 = vmatmul.f32.gmra.mxu3 %v238_v25 }
  0x63   : > { %282 = vmatmul.f32.gmra.mxu0 %v226_v26  ;;  %294 = vmatmul.f32.gmra.mxu1 %v230_v27 }
  0x69   : > { %309 = vmatmul.f32.gmra.mxu2 %v235_v28  ;;  %321 = vmatmul.f32.gmra.mxu3 %v239_v29 }
  0x6b   : > { %285 = vmatmul.f32.gmra.mxu0 %v227_v30  ;;  %297 = vmatmul.f32.gmra.mxu1 %v231_v31 }
  0xd0   : > { %v277_v33 = vpop.f32.mrf.mxu0  ;;  %v289_v34 = vpop.f32.mrf.mxu1 }
  0xd1   : > { %v278_v35 = vadd.f32 %v589_v32, %v277_v33  ;;  %v290_v36 = vadd.f32 %v589_v32, %v289_v34 }
  0xd3   : > { %325 = vst [vmem:[%s912_s20] sm:$0xff] %v278_v35 }
  0xd4   : > { %329 = vst [vmem:[%s912_s20 + $0x20] sm:$0xff] %v290_v36  ;;  %v301_v37 = vpop.f32.mrf.mxu2  ;;  %v313_v38 = vpop.f32.mrf.mxu3 }
  0xd5   : > { %v302_v39 = vadd.f32 %v589_v32, %v301_v37  ;;  %v314_v40 = vadd.f32 %v589_v32, %v313_v38 }
  0xd7   : > { %333 = vst [vmem:[%s912_s20 + $0x40] sm:$0xff] %v302_v39 }
  0xd8   : > { %337 = vst [vmem:[%s912_s20 + $0x60] sm:$0xff] %v314_v40  ;;  %v280_v41 = vpop.f32.mrf.mxu0  ;;  %v292_v42 = vpop.f32.mrf.mxu1 }
  0xd9   : > { %v281_v43 = vadd.f32 %v589_v32, %v280_v41  ;;  %v293_v44 = vadd.f32 %v589_v32, %v292_v42 }
  0xdb   : > { %326 = vst [vmem:[%s912_s20 + $0x8] sm:$0xff] %v281_v43 }
  0xdc   : > { %330 = vst [vmem:[%s912_s20 + $0x28] sm:$0xff] %v293_v44  ;;  %v304_v45 = vpop.f32.mrf.mxu2  ;;  %v316_v46 = vpop.f32.mrf.mxu3 }
  0xdd   : > { %v305_v47 = vadd.f32 %v589_v32, %v304_v45  ;;  %v317_v48 = vadd.f32 %v589_v32, %v316_v46 }
  0xdf   : > { %334 = vst [vmem:[%s912_s20 + $0x48] sm:$0xff] %v305_v47 }
  0xe0   : > { %338 = vst [vmem:[%s912_s20 + $0x68] sm:$0xff] %v317_v48  ;;  %v283_v49 = vpop.f32.mrf.mxu0  ;;  %v295_v50 = vpop.f32.mrf.mxu1 }
  0xe1   : > { %v284_v51 = vadd.f32 %v589_v32, %v283_v49  ;;  %v296_v52 = vadd.f32 %v589_v32, %v295_v50 }
  0xe3   : > { %327 = vst [vmem:[%s912_s20 + $0x10] sm:$0xff] %v284_v51 }
  0xe4   : > { %331 = vst [vmem:[%s912_s20 + $0x30] sm:$0xff] %v296_v52  ;;  %v307_v53 = vpop.f32.mrf.mxu2  ;;  %v319_v54 = vpop.f32.mrf.mxu3 }
  0xe5   : > { %v308_v55 = vadd.f32 %v589_v32, %v307_v53  ;;  %v320_v56 = vadd.f32 %v589_v32, %v319_v54 }
  0xe7   : > { %335 = vst [vmem:[%s912_s20 + $0x50] sm:$0xff] %v308_v55 }
  0xe8   : > { %339 = vst [vmem:[%s912_s20 + $0x70] sm:$0xff] %v320_v56  ;;  %v286_v57 = vpop.f32.mrf.mxu0  ;;  %v298_v58 = vpop.f32.mrf.mxu1 }
  0xe9   : > { %v287_v59 = vadd.f32 %v589_v32, %v286_v57  ;;  %v299_v60 = vadd.f32 %v589_v32, %v298_v58 }
  0xeb   : > { %328 = vst [vmem:[%s912_s20 + $0x18] sm:$0xff] %v287_v59 }
  0xec   : > { %332 = vst [vmem:[%s912_s20 + $0x38] sm:$0xff] %v299_v60  ;;  %v310_v61 = vpop.f32.mrf.mxu2  ;;  %v322_v62 = vpop.f32.mrf.mxu3 }
  0xed   : > { %v311_v63 = vadd.f32 %v589_v32, %v310_v61  ;;  %v323_v0 = vadd.f32 %v589_v32, %v322_v62 }
  0xef   : > { %336 = vst [vmem:[%s912_s20 + $0x58] sm:$0xff] %v311_v63 }
  0xf0   : > { %340 = vst [vmem:[%s912_s20 + $0x78] sm:$0xff] %v323_v0 }
  0xf1   : > { %707 = shalt.err (!%p704_p9)
}
  0xf2   : > { %s757_s11 = smov 128   ;;  %s758_s23 = smov 8  }
  0xf3   : > { %527 = dma.vmem_to_hbm [thread:$0]  (%p844_p13), %s355_s26, 2048, %s357_s27, %s342_s19, %s757_s11, %s757_s11, %s758_s23  }
  0xf4 PF: > { %s371_s25 = sand.u32 1, %s738_s12   ;;  %p973_p10 = scmp.ge.s32.totalorder %s750_s15, 2 }
  0xf5   : > { %s372_s4 = scalar_lea.sflag [#allocation4], %s371_s25 }
  0xf6   : > { %p541_p11 = pnand %p973_p10, %p849_p4 }
  0xf8   : > { %p542_p0 = pneg %p541_p11 }
  0xfa   : > { %733 = dma.done.wait (%p542_p0), %s372_s4, 2048  }
  0xfb   : > { %735 = vsyncadd (%p542_p0), %s372_s4, 4294965248  ;;  %p17_p2 = scmp.ge.s32.totalorder %s824_s5, 4   ;;  %s974_s12 = smov %s742_s13 }
  0xfc   : > { %s975_s13 = smov %s746_s14  ;;  %s976_s14 = smov %s836_s8 }
  0xfd   : > { %s977_s15 = smov %s824_s5  ;;  %19 = sbr.rel (!%p17_p2) target bundleno = 6 (0x6), region = 85 }
 0x102   :  { %378 = vsyncpa [#allocation3], 1 }
 0x103   :  { %380 = vsyncpa [#allocation3 + $0x1], 1 }
 0x104   :  { %381 = vsyncpa [#allocation6], 1 }
 0x105   :  { %382 = vsyncpa [#allocation4], 1 }
 0x106   :  { %384 = vsyncpa [#allocation4 + $0x1], 1 }

</bundles_post_ra>
